<compile_context>
chip_gen: v7x
topology: tpu7x:2x2x1
jax: 0.10.0
libtpu: 0.0.40
codegen_flags: <defaults>
</compile_context>

<pallas_src>
import functools
import math

import jax
import jax.numpy as jnp
from jax.experimental import pallas as pl
from jax.experimental.pallas import tpu as pltpu


# ---------------------------------------------------------------------------
# In-kernel helpers
# ---------------------------------------------------------------------------

def _erf_poly(x):
    """Abramowitz & Stegun 7.1.26 erf approximation (max abs err ~1.5e-7)."""
    a1, a2, a3, a4, a5 = (0.254829592, -0.284496736, 1.421413741,
                          -1.453152027, 1.061405429)
    p = 0.3275911
    s = jnp.where(x < 0.0, -1.0, 1.0)
    z = jnp.abs(x)
    t = 1.0 / (1.0 + p * z)
    poly = ((((a5 * t + a4) * t + a3) * t + a2) * t + a1) * t
    return s * (1.0 - poly * jnp.exp(-z * z))


def _apply_activation(h, activation):
    if activation == "relu":
        return jnp.maximum(h, 0.0)
    # Exact (erf-based) GELU, matching torch.nn.GELU()'s default.
    return 0.5 * h * (1.0 + _erf_poly(h * 0.7071067811865476))


# ---------------------------------------------------------------------------
# Kernels
# ---------------------------------------------------------------------------

def _ffn_kernel_resident(x_ref, w1_ref, b1_ref, w2_ref, b2_ref, o_ref, *,
                         activation):
    """Single hidden tile: weights fully resident in VMEM, no accumulator."""
    h = jnp.dot(x_ref[...], w1_ref[...], preferred_element_type=jnp.float32)
    h = _apply_activation(h + b1_ref[...], activation)          # f32 epilogue
    out = jnp.dot(h.astype(w2_ref.dtype), w2_ref[...],
                  preferred_element_type=jnp.float32)
    o_ref[...] = (out + b2_ref[...]).astype(o_ref.dtype)


def _ffn_kernel_streamed(x_ref, w1_ref, b1_ref, w2_ref, b2_ref, o_ref,
                         acc_ref, *, activation):
    """Hidden axis tiled (innermost, 'arbitrary'); f32 VMEM accumulator."""
    j = pl.program_id(1)

    @pl.when(j == 0)
    def _():
        acc_ref[...] = jnp.zeros_like(acc_ref)

    # First linear on this hidden tile: (tm, dim) @ (dim, th) -> f32.
    h = jnp.dot(x_ref[...], w1_ref[...], preferred_element_type=jnp.float32)
    h = _apply_activation(h + b1_ref[...], activation)

    # Second linear (partial contribution of this hidden tile), accumulate.
    acc_ref[...] += jnp.dot(h.astype(w2_ref.dtype), w2_ref[...],
                            preferred_element_type=jnp.float32)

    @pl.when(j == pl.num_programs(1) - 1)
    def _():
        o_ref[...] = (acc_ref[...] + b2_ref[...]).astype(o_ref.dtype)


# ---------------------------------------------------------------------------
# Tile / VMEM budgeting
# ---------------------------------------------------------------------------

def _round_up(n, m):
    return ((n + m - 1) // m) * m


def _vmem_budget_and_cores():
    """(vmem_limit_bytes, v7x-like two-core hint) for the current chip."""
    cap = None
    try:
        cap = int(pltpu.get_tpu_info().vmem_capacity_bytes)
    except Exception:
        cap = None
    if cap is None or cap < 32 * (1 << 20) or cap > (1 << 31):
        # Unknown chip: a 48 MiB budget fits every TPU generation.
        return 48 * (1 << 20), False
    budget = max(min(int(cap * 0.78), cap - 16 * (1 << 20)), 16 * (1 << 20))
    two_core = cap <= 80 * (1 << 20)   # v7x-class: 64 MiB VMEM/TC, 2 TCs/chip
    return budget, two_core


def _vmem_estimate(tm, th, dim, x_isz, w_isz, out_isz, with_acc):
    """Rough VMEM working set: double-buffered tiles + f32 accumulator."""
    x_t = tm * dim * x_isz
    w1_t = dim * th * w_isz
    w2_t = th * dim * w_isz
    o_t = tm * dim * out_isz
    b1_t = 8 * th * 4            # (1, th) padded to 8 sublanes
    b2_t = 8 * dim * 4
    acc = tm * dim * 4 if with_acc else 0
    return 2 * (x_t + w1_t + w2_t + o_t + b1_t + b2_t) + acc


def _select_tiles(rows, dim, hidden_p, x_isz, w_isz, out_isz, budget,
                  two_core, tm_req=None, th_req=None):
    """Pick (tm, th): th == hidden_p means the weights-resident fast path."""
    sub = 8 if x_isz >= 4 else 16
    row_cap = _round_up(max(rows, 1), sub)
    tm_max = row_cap
    if two_core and rows > sub:
        # Give each TensorCore at least one row block on v7x-class parts.
        tm_max = min(tm_max, _round_up(-(-rows // 2), sub))

    tm_pref = 512 if budget >= 80 * (1 << 20) else 256
    tm_cands = []
    for t in (tm_pref, 256, 128, 64, 32, 16, 8):
        t = _round_up(min(t, tm_max), sub)
        if t not in tm_cands:
            tm_cands.append(t)
    tm_cands.sort(reverse=True)

    th_cands = []
    for t in (hidden_p, 4096, 2048, 1024, 512, 256, 128):
        if t <= hidden_p and hidden_p % t == 0 and t not in th_cands:
            th_cands.append(t)
    th_cands.sort(reverse=True)

    if tm_req is not None:
        tm_cands = [min(max(_round_up(tm_req, sub), sub), row_cap)]
    if th_req is not None and th_req <= hidden_p and hidden_p % th_req == 0:
        th_cands = [th_req]

    # 1) Weights-fully-resident fast path (single hidden tile, no acc).
    if th_cands[0] == hidden_p:
        for tm in tm_cands:
            if tm < min(128, tm_max):
                break
            if _vmem_estimate(tm, hidden_p, dim, x_isz, w_isz, out_isz,
                              with_acc=False) <= budget:
                return tm, hidden_p
    # 2) Streamed weights: maximize tm first (cuts HBM weight re-streaming,
    #    which scales as cdiv(rows, tm)), then th (cuts grid-step overhead).
    for tm in tm_cands:
        for th in th_cands:
            with_acc = th != hidden_p
            if _vmem_estimate(tm, th, dim, x_isz, w_isz, out_isz,
                              with_acc) <= budget:
                return tm, th
    # 3) Pathological fallback: smallest tiles.
    return tm_cands[-1], th_cands[-1]


# ---------------------------------------------------------------------------
# Wrapper
# ---------------------------------------------------------------------------

@functools.partial(
    jax.jit,
    static_argnames=("tm", "th", "activation", "compute_dtype", "vmem_limit"))
def _feed_forward_impl(x, w1, b1, w2, b2, *, tm, th, activation,
                       compute_dtype, vmem_limit):
    orig_shape = x.shape
    out_dtype = x.dtype
    dim = orig_shape[-1]
    hidden = w1.shape[1]
    rows = math.prod(orig_shape[:-1]) if len(orig_shape) > 1 else 1
    hidden_p = _round_up(hidden, 128)

    # Zero-pad the hidden axis once: zero W1 columns / b1 entries give
    # activation(0) = 0 (ReLU and GELU), and zero W2 rows contribute nothing.
    if hidden_p != hidden:
        pad = hidden_p - hidden
        w1 = jnp.pad(w1, ((0, 0), (0, pad)))
        b1 = jnp.pad(b1, ((0, pad),))
        w2 = jnp.pad(w2, ((0, pad), (0, 0)))

    cdt = out_dtype if compute_dtype is None else compute_dtype
    # Cast once, wrapper-side (halves x/W DMA + VMEM on the bf16 path and
    # removes per-step VPU casts inside the kernel).
    x2 = x.reshape(rows, dim).astype(cdt)
    w1c = w1.astype(cdt)
    w2c = w2.astype(cdt)
    b1_2d = b1.astype(jnp.float32).reshape(1, hidden_p)
    b2_2d = b2.astype(jnp.float32).reshape(1, dim)

    resident = (th == hidden_p)
    row_tiles = pl.cdiv(rows, tm)
    hidden_tiles = hidden_p // th

    # Cost estimate with the actual HBM streaming pattern.
    stream_factor = 1 if resident else row_tiles
    bytes_accessed = (x2.size * x2.dtype.itemsize
                      + stream_factor * (w1c.size * w1c.dtype.itemsize
                                         + w2c.size * w2c.dtype.itemsize)
                      + b1_2d.size * 4 + b2_2d.size * 4
                      + rows * dim * jnp.dtype(out_dtype).itemsize)
    cost = pl.CostEstimate(
        flops=4 * rows * dim * hidden,
        transcendentals=0 if activation == "relu" else rows * hidden_p,
        bytes_accessed=bytes_accessed)

    if resident:
        kernel = functools.partial(_ffn_kernel_resident, activation=activation)
        grid = (row_tiles,)
        in_specs = [
            pl.BlockSpec((tm, dim), lambda i: (i, 0)),           # x rows
            pl.BlockSpec((dim, hidden_p), lambda i: (0, 0)),     # W1 (resident)
            pl.BlockSpec((1, hidden_p), lambda i: (0, 0)),       # b1
            pl.BlockSpec((hidden_p, dim), lambda i: (0, 0)),     # W2 (resident)
            pl.BlockSpec((1, dim), lambda i: (0, 0)),            # b2
        ]
        out_specs = pl.BlockSpec((tm, dim), lambda i: (i, 0))
        scratch_shapes = []
        dim_sem = ("parallel",)
    else:
        kernel = functools.partial(_ffn_kernel_streamed, activation=activation)
        grid = (row_tiles, hidden_tiles)
        in_specs = [
            pl.BlockSpec((tm, dim), lambda i, j: (i, 0)),        # x rows
            pl.BlockSpec((dim, th), lambda i, j: (0, j)),        # W1 tile
            pl.BlockSpec((1, th), lambda i, j: (0, j)),          # b1 tile
            pl.BlockSpec((th, dim), lambda i, j: (j, 0)),        # W2 tile
            pl.BlockSpec((1, dim), lambda i, j: (0, 0)),         # b2
        ]
        out_specs = pl.BlockSpec((tm, dim), lambda i, j: (i, 0))
        scratch_shapes = [pltpu.VMEM((tm, dim), jnp.float32)]    # accumulator
        dim_sem = ("parallel", "arbitrary")

    out = pl.pallas_call(
        kernel,
        out_shape=jax.ShapeDtypeStruct((rows, dim), out_dtype),
        grid_spec=pltpu.PrefetchScalarGridSpec(
            num_scalar_prefetch=0,
            grid=grid,
            in_specs=in_specs,
            out_specs=out_specs,
            scratch_shapes=scratch_shapes,
        ),
        compiler_params=pltpu.CompilerParams(
            dimension_semantics=dim_sem,
            vmem_limit_bytes=int(vmem_limit),
        ),
        cost_estimate=cost,
    )(x2, w1c, b1_2d, w2c, b2_2d)

    return out.reshape(orig_shape)


def feed_forward(x, w1, b1, w2, b2, *, activation="relu",
                 compute_dtype=jnp.bfloat16, tm=None, th=None):
    """x: (..., dim) -> (..., dim). Fused MLP in a single Pallas kernel.

    compute_dtype controls the MXU input dtype (default bf16; accumulation,
    bias add and activation are always f32). Pass compute_dtype=None for a
    pure-f32 MXU path.
    """
    if activation not in ("relu", "gelu"):
        raise ValueError(f"unknown activation: {activation}")
    dim = x.shape[-1]
    hidden = w1.shape[1]
    rows = math.prod(x.shape[:-1]) if x.ndim > 1 else 1
    hidden_p = _round_up(hidden, 128)

    cdt = None if compute_dtype is None else jnp.dtype(compute_dtype)
    x_isz = jnp.dtype(x.dtype if cdt is None else cdt).itemsize
    out_isz = jnp.dtype(x.dtype).itemsize

    budget, two_core = _vmem_budget_and_cores()
    tm_eff, th_eff = _select_tiles(rows, dim, hidden_p, x_isz, x_isz, out_isz,
                                   budget, two_core, tm, th)

    return _feed_forward_impl(x, w1, b1, w2, b2, tm=tm_eff, th=th_eff,
                              activation=activation, compute_dtype=cdt,
                              vmem_limit=budget)


def init_params(key, dim, hidden_dim, dtype=jnp.float32):
    """Deterministic init matching torch.nn.Linear shapes ((in, out) layout)."""
    k1, k2, k3, k4 = jax.random.split(key, 4)
    bound1 = 1.0 / (dim ** 0.5)
    bound2 = 1.0 / (hidden_dim ** 0.5)
    w1 = jax.random.uniform(k1, (dim, hidden_dim), dtype, -bound1, bound1)
    b1 = jax.random.uniform(k2, (hidden_dim,), dtype, -bound1, bound1)
    w2 = jax.random.uniform(k3, (hidden_dim, dim), dtype, -bound2, bound2)
    b2 = jax.random.uniform(k4, (dim,), dtype, -bound2, bound2)
    return w1, b1, w2, b2


if __name__ == "__main__":
    # Small but lane-dense shapes (dim multiple of 128 keeps output stores
    # unmasked).
    batch, seq, dim, hidden_dim = 2, 8, 128, 256
    key = jax.random.PRNGKey(0)
    kx, kp = jax.random.split(key)
    x = jax.random.normal(kx, (batch, seq, dim), jnp.float32)
    w1, b1, w2, b2 = init_params(kp, dim, hidden_dim)

    # Pure-JAX references of the forward semantics.
    ref_relu = jnp.maximum(x @ w1 + b1, 0.0) @ w2 + b2

    # 1) Default path: bf16 on the MXU, f32 accumulate / bias / activation.
    out = jax.block_until_ready(feed_forward(x, w1, b1, w2, b2))
    assert out.shape == x.shape
    assert jnp.allclose(out, ref_relu, atol=5e-2, rtol=5e-2), (
        float(jnp.max(jnp.abs(out - ref_relu))))

    # 2) Pure f32 path (tight tolerance; MXU multi-pass vs XLA default only).
    out_f32 = jax.block_until_ready(
        feed_forward(x, w1, b1, w2, b2, compute_dtype=None))
    assert jnp.allclose(out_f32, ref_relu, atol=5e-3, rtol=5e-3), (
        float(jnp.max(jnp.abs(out_f32 - ref_relu))))

    # 3) Exact-erf GELU + non-128-divisible hidden size (exercises the
    #    zero-padding path). Matches torch.nn.GELU's default (erf) form.
    w1o, b1o, w2o, b2o = init_params(jax.random.PRNGKey(1), dim, 200)
    ref_gelu = jax.nn.gelu(x @ w1o + b1o, approximate=False) @ w2o + b2o
    out_g = jax.block_until_ready(
        feed_forward(x, w1o, b1o, w2o, b2o, activation="gelu",
                     compute_dtype=None))
    assert jnp.allclose(out_g, ref_gelu, atol=5e-3, rtol=5e-3), (
        float(jnp.max(jnp.abs(out_g - ref_gelu))))

    # 4) Force the streamed-weights kernel (2 hidden tiles + f32 accumulator).
    out_s = jax.block_until_ready(
        feed_forward(x, w1, b1, w2, b2, compute_dtype=None, th=128))
    assert jnp.allclose(out_s, ref_relu, atol=5e-3, rtol=5e-3), (
        float(jnp.max(jnp.abs(out_s - ref_relu))))

    print("KERNEL_OK")
</pallas_src>

<mosaic_0001>
module attributes {stable_mosaic.version = 11 : i64} {
  func.func @_ffn_kernel_resident(%arg0: i32, %arg1: memref<16x128xbf16, #tpu.memory_space<vmem>>, %arg2: memref<128x256xbf16, #tpu.memory_space<vmem>>, %arg3: memref<1x256xf32, #tpu.memory_space<vmem>>, %arg4: memref<256x128xbf16, #tpu.memory_space<vmem>>, %arg5: memref<1x128xf32, #tpu.memory_space<vmem>>, %arg6: memref<16x128xf32, #tpu.memory_space<vmem>>) attributes {dimension_semantics = [#tpu.dimension_semantics<parallel>], iteration_bounds = array<i64: 1>, scalar_prefetch = 0 : i64, scratch_operands = 0 : i64, tpu.core_type = #tpu.core_type<tc>, window_params = [{transform_indices = @transform_0, window_bounds = array<i64: 16, 128>}, {pipeline_mode = #tpu.pipeline_mode<synchronous>, transform_indices = @transform_1, window_bounds = array<i64: 128, 256>}, {pipeline_mode = #tpu.pipeline_mode<synchronous>, transform_indices = @transform_2, window_bounds = array<i64: 1, 256>}, {pipeline_mode = #tpu.pipeline_mode<synchronous>, transform_indices = @transform_3, window_bounds = array<i64: 256, 128>}, {pipeline_mode = #tpu.pipeline_mode<synchronous>, transform_indices = @transform_4, window_bounds = array<i64: 1, 128>}, {transform_indices = @transform_5, window_bounds = array<i64: 16, 128>}]} {
    %c0 = arith.constant 0 : index
    %c0_0 = arith.constant 0 : index
    %0 = vector.load %arg1[%c0, %c0_0] : memref<16x128xbf16, #tpu.memory_space<vmem>>, vector<16x128xbf16>
    %c0_1 = arith.constant 0 : index
    %c0_2 = arith.constant 0 : index
    %1 = vector.load %arg2[%c0_1, %c0_2] : memref<128x256xbf16, #tpu.memory_space<vmem>>, vector<128x256xbf16>
    %cst = arith.constant dense<0.000000e+00> : vector<16x256xf32>
    %2 = tpu.matmul %0, %1, %cst {dimension_numbers = #tpu.dot_dimension_numbers<[1], [0], [0], [1], [0, 0, 1, 1], [], []>} : vector<16x128xbf16>, vector<128x256xbf16>, vector<16x256xf32> -> vector<16x256xf32>
    %c0_3 = arith.constant 0 : index
    %c0_4 = arith.constant 0 : index
    %3 = vector.load %arg3[%c0_3, %c0_4] : memref<1x256xf32, #tpu.memory_space<vmem>>, vector<1x256xf32>
    %4 = vector.broadcast %3 : vector<1x256xf32> to vector<16x256xf32>
    %5 = arith.addf %2, %4 : vector<16x256xf32>
    %cst_5 = arith.constant 0.000000e+00 : f32
    %6 = vector.broadcast %cst_5 : f32 to vector<16x256xf32>
    %7 = arith.maximumf %5, %6 : vector<16x256xf32>
    %8 = arith.truncf %7 : vector<16x256xf32> to vector<16x256xbf16>
    %c0_6 = arith.constant 0 : index
    %c0_7 = arith.constant 0 : index
    %9 = vector.load %arg4[%c0_6, %c0_7] : memref<256x128xbf16, #tpu.memory_space<vmem>>, vector<256x128xbf16>
    %cst_8 = arith.constant dense<0.000000e+00> : vector<16x128xf32>
    %10 = tpu.matmul %8, %9, %cst_8 {dimension_numbers = #tpu.dot_dimension_numbers<[1], [0], [0], [1], [0, 0, 1, 1], [], []>} : vector<16x256xbf16>, vector<256x128xbf16>, vector<16x128xf32> -> vector<16x128xf32>
    %c0_9 = arith.constant 0 : index
    %c0_10 = arith.constant 0 : index
    %11 = vector.load %arg5[%c0_9, %c0_10] : memref<1x128xf32, #tpu.memory_space<vmem>>, vector<1x128xf32>
    %12 = vector.broadcast %11 : vector<1x128xf32> to vector<16x128xf32>
    %13 = arith.addf %10, %12 : vector<16x128xf32>
    %c0_11 = arith.constant 0 : index
    %c0_12 = arith.constant 0 : index
    %14 = vector.load %arg6[%c0_11, %c0_12] : memref<16x128xf32, #tpu.memory_space<vmem>>, vector<16x128xf32>
    tpu.vector_store %arg6[%c0_11, %c0_12], %13 {strides = array<i32>} : memref<16x128xf32, #tpu.memory_space<vmem>>, vector<16x128xf32>,
    return
  }
  func.func @transform_0(%arg0: i32) -> (i32, i32) {
    %c0_i32 = arith.constant 0 : i32
    %c0_i32_0 = arith.constant 0 : i32
    return %arg0, %c0_i32 : i32, i32
  }
  func.func @transform_1(%arg0: i32) -> (i32, i32) {
    %c0_i32 = arith.constant 0 : i32
    %c0_i32_0 = arith.constant 0 : i32
    %c0_i32_1 = arith.constant 0 : i32
    return %c0_i32, %c0_i32_0 : i32, i32
  }
  func.func @transform_2(%arg0: i32) -> (i32, i32) {
    %c0_i32 = arith.constant 0 : i32
    %c0_i32_0 = arith.constant 0 : i32
    %c0_i32_1 = arith.constant 0 : i32
    return %c0_i32, %c0_i32_0 : i32, i32
  }
  func.func @transform_3(%arg0: i32) -> (i32, i32) {
    %c0_i32 = arith.constant 0 : i32
    %c0_i32_0 = arith.constant 0 : i32
    %c0_i32_1 = arith.constant 0 : i32
    return %c0_i32, %c0_i32_0 : i32, i32
  }
  func.func @transform_4(%arg0: i32) -> (i32, i32) {
    %c0_i32 = arith.constant 0 : i32
    %c0_i32_0 = arith.constant 0 : i32
    %c0_i32_1 = arith.constant 0 : i32
    return %c0_i32, %c0_i32_0 : i32, i32
  }
  func.func @transform_5(%arg0: i32) -> (i32, i32) {
    %c0_i32 = arith.constant 0 : i32
    %c0_i32_0 = arith.constant 0 : i32
    return %arg0, %c0_i32 : i32, i32
  }
}

</mosaic_0001>

<bundles_post_ra>
// kernel: _feed_forward_impl.1
= control target key start
LH: loop header
LB: loop body
LE: loop exit
PB: predicated region body
PF: predicated region fallthrough
CT: control target
= control target key end

     0   :  { %v506_v2 = vmov 0   ;;  %s657_s0 = inlined_call_operand.vmem [shape: bf16[16,128], index: 0, kind: input, shape index: {}]   ;;  %s658_s1 = inlined_call_operand.vmem [shape: bf16[128,256], index: 1, kind: input, shape index: {}]   ;;  %s659_s2 = inlined_call_operand.vmem [shape: f32[1,256], index: 2, kind: input, shape index: {}]   ;;  %s660_s3 = inlined_call_operand.vmem [shape: bf16[256,128], index: 3, kind: input, shape index: {}]   ;;  %s661_s4 = inlined_call_operand.vmem [shape: f32[1,128], index: 4, kind: input, shape index: {}]   ;;  %s662_s5 = inlined_call_operand.hbm [shape: f32[16,128], index: 5, kind: output, shape index: {}]  }
   0x1   :  { %v441_v0 = vld [vmem:[%s658_s1 + $0x4] ss:$8 sps:$4 sm:$0xff]   ;;  %v443_v1 = vld [vmem:[%s658_s1] ss:$8 sps:$4 sm:$0xff]   ;;  %170 = vmatprep.mubr.bf16.mxu0 %v506_v2  ;;  %v444_v3 = vld [vmem:[%s658_s1 + $0x14] ss:$8 sps:$4 sm:$0xff]  }
   0x2   :  { %138 = vmatprep.subr.bf16.mxu0 %v441_v0  ;;  %v446_v4 = vld [vmem:[%s658_s1 + $0x10] ss:$8 sps:$4 sm:$0xff]   ;;  %v447_v5 = vld [vmem:[%s658_s1 + $0x24] ss:$8 sps:$4 sm:$0xff]   ;;  %v449_v6 = vld [vmem:[%s658_s1 + $0x20] ss:$8 sps:$4 sm:$0xff]  }
   0x3   :  { %139 = vmatpush1.bf16.msra.mxu0 %v443_v1  ;;  %v450_v7 = vld [vmem:[%s658_s1 + $0x34] ss:$8 sps:$4 sm:$0xff]   ;;  %v452_v8 = vld [vmem:[%s658_s1 + $0x30] ss:$8 sps:$4 sm:$0xff]   ;;  %v453_v9 = vld [vmem:[%s658_s1 + $0x44] ss:$8 sps:$4 sm:$0xff]  }
   0x4   :  { %140 = vmatprep.subr.bf16.mxu0 %v444_v3  ;;  %v466_v10 = vld [vmem:[%s660_s3 + $0x40] sm:$0xff]   ;;  %v456_v13 = vld [vmem:[%s658_s1 + $0x54] ss:$8 sps:$4 sm:$0xff]   ;;  %v468_v14 = vld [vmem:[%s660_s3 + $0x48] sm:$0xff]  }
   0x5   :  { %v455_v11 = vld [vmem:[%s658_s1 + $0x40] ss:$8 sps:$4 sm:$0xff]   ;;  %415 = vmatprep.subr.bf16.mxu1 %v466_v10  ;;  %v470_v16 = vld [vmem:[%s660_s3 + $0x50] sm:$0xff]   ;;  %v459_v18 = vld [vmem:[%s658_s1 + $0x64] ss:$8 sps:$4 sm:$0xff]  }
   0x6   :  { %v467_v12 = vld [vmem:[%s660_s3] sm:$0xff]   ;;  %v469_v15 = vld [vmem:[%s660_s3 + $0x8] sm:$0xff]   ;;  %v458_v17 = vld [vmem:[%s658_s1 + $0x50] ss:$8 sps:$4 sm:$0xff]  }
   0x7   :  { %141 = vmatpush1.bf16.msra.mxu0 %v446_v4  ;;  %416 = vmatpush3.bf16.msra.mxu1 %v467_v12  ;;  %v471_v19 = vld [vmem:[%s660_s3 + $0x10] sm:$0xff]   ;;  %v472_v20 = vld [vmem:[%s660_s3 + $0x58] sm:$0xff]   ;;  %v461_v21 = vld [vmem:[%s658_s1 + $0x60] ss:$8 sps:$4 sm:$0xff]  }
   0x8   :  { %142 = vmatprep.subr.bf16.mxu0 %v447_v5  ;;  %417 = vmatprep.subr.bf16.mxu1 %v468_v14  ;;  %v462_v22 = vld [vmem:[%s658_s1 + $0x74] ss:$8 sps:$4 sm:$0xff]   ;;  %v474_v24 = vld [vmem:[%s660_s3 + $0x60] sm:$0xff]  }
   0x9   :  { %v473_v23 = vld [vmem:[%s660_s3 + $0x18] sm:$0xff]  }
   0xb   :  { %143 = vmatpush1.bf16.msra.mxu0 %v449_v6  ;;  %418 = vmatpush3.bf16.msra.mxu1 %v469_v15 }
   0xc   :  { %144 = vmatprep.subr.bf16.mxu0 %v450_v7  ;;  %419 = vmatprep.subr.bf16.mxu1 %v470_v16 }
   0xf   :  { %145 = vmatpush1.bf16.msra.mxu0 %v452_v8  ;;  %420 = vmatpush3.bf16.msra.mxu1 %v471_v19 }
  0x10   :  { %146 = vmatprep.subr.bf16.mxu0 %v453_v9  ;;  %421 = vmatprep.subr.bf16.mxu1 %v472_v20 }
  0x13   :  { %147 = vmatpush1.bf16.msra.mxu0 %v455_v11 }
  0x14   :  { %148 = vmatprep.subr.bf16.mxu0 %v456_v13 }
  0x17   :  { %149 = vmatpush1.bf16.msra.mxu0 %v458_v17 }
  0x18   :  { %150 = vmatprep.subr.bf16.mxu0 %v459_v18 }
  0x19   :  { %10 = vsyncpa [#allocation3], 0  ;;  %v464_v25 = vld [vmem:[%s658_s1 + $0x70] ss:$8 sps:$4 sm:$0xff]   ;;  %422 = vmatpush3.bf16.msra.mxu1 %v473_v23  ;;  %v475_v26 = vld [vmem:[%s660_s3 + $0x20] sm:$0xff]   ;;  %v42_v34 = vlaneseq  ;;  %s507_s9 = smov [#allocation2]  }
  0x1a   :  { %423 = vmatprep.subr.bf16.mxu1 %v474_v24  ;;  %v476_v27 = vld [vmem:[%s660_s3 + $0x68] sm:$0xff]   ;;  %v465_v28 = vld [vmem:[%s657_s0] sm:$0xff]   ;;  %v478_v30 = vld [vmem:[%s660_s3 + $0x70] sm:$0xff]   ;;  %s370_s10 = sshll.u32 %s507_s9, 4  ;;  %s371_s10 = int_to_ptr.vmem [resolvable:$true] %s370_s10 }
  0x1b   :  { %151 = vmatpush1.bf16.msra.mxu0 %v461_v21  ;;  %v477_v29 = vld [vmem:[%s660_s3 + $0x28] sm:$0xff]   ;;  %v479_v31 = vld [vmem:[%s660_s3 + $0x30] sm:$0xff]   ;;  %v480_v32 = vld [vmem:[%s660_s3 + $0x78] sm:$0xff]   ;;  %v43_v35 = vshrl.u32 %v42_v34, 7  ;;  %s482_s11 = scalar_lea.vmem %s371_s10, 256  ;;  %p487_p1 = scmp.lt.s32.totalorder %s371_s10, %s371_s10 }
  0x1c   :  { %152 = vmatprep.subr.bf16.mxu0 %v462_v22  ;;  %v481_v33 = vld [vmem:[%s660_s3 + $0x38] sm:$0xff]   ;;  %v40_v37 = vld [vmem:[%s659_s2] sm:$0x3]  ;;  %p483_p0 = scmp.ne.s32.totalorder %s371_s10, %s482_s11  ;;  %p488_p2 = scmp.lt.s32.totalorder %s482_s11, %s482_s11 }
  0x1d   :  { %424 = vmatpush3.bf16.msra.mxu1 %v475_v26  ;;  %v44_v36 = vsub.s32 0, %v43_v35  ;;  %v48_v38 = vsub.s32 1, %v43_v35  ;;  %v398_v56 = vld [vmem:[%s661_s4] ss:$0 sm:$0xff] }
  0x1e   :  { %425 = vmatprep.subr.bf16.mxu1 %v476_v27  ;;  %p489_p3 = por %p488_p2, %p487_p1 }
  0x1f   :  { %153 = vmatpush1.bf16.msra.mxu0 %v464_v25  ;;  %v45_v39 = vrot.slane %v40_v37, %v44_v36  ;;  %v49_v40 = vrot.slane %v40_v37, %v48_v38 }
  0x20   :  { %p490_p4 = pnand %p489_p3, %p483_p0 }
  0x21   :  { %426 = vmatpush3.bf16.msra.mxu1 %v477_v29 }
  0x22   :  { %171 = vmatmul.mubr.bf16.vlgmr.msra.gmra.mrb[0].mxu0 %v465_v28  ;;  %427 = vmatprep.subr.bf16.mxu1 %v478_v30 }
  0x25   :  { %428 = vmatpush3.bf16.msra.mxu1 %v479_v31 }
  0x26   :  { %429 = vmatprep.subr.bf16.mxu1 %v480_v32 }
  0x29   :  { %430 = vmatpush3.bf16.msra.mxu1 %v481_v33 }
  0xf5   :  { %v172_v41 = vpop.f32.mrb[0].mxu0 }
  0xf6   :  { %v173_v42 = vadd.f32 %v172_v41, %v45_v39  ;;  %v174_v43 = vpop.f32.mrb[1].mxu0 }
  0xf7   :  { %v175_v44 = vadd.f32 %v174_v43, %v49_v40  ;;  %v176_v45 = vpop.f32.mrb[2].mxu0 }
  0xf8   :  { %v177_v46 = vadd.f32 %v176_v45, %v45_v39  ;;  %v178_v47 = vpop.f32.mrb[3].mxu0  ;;  %v181_v49 = vmax.f32 %v173_v42, 0.0 }
  0xf9   :  { %v179_v48 = vadd.f32 %v178_v47, %v49_v40  ;;  %v182_v51 = vmax.f32 %v175_v44, 0.0 }
  0xfa   :  { %v183_v50 = vmax.f32 %v177_v46, 0.0 }
  0xfb   :  { %v184_v52 = vmax.f32 %v179_v48, 0.0 }
  0xfc   :  { %v185_v53 = vpack.c.bf16 %v183_v50, %v181_v49 }
  0xfd   :  { %v186_v54 = vpack.c.bf16 %v184_v52, %v182_v51 }
  0xff   :  { %354 = vmatprep.mubr.bf16.mxu1 %v186_v54 }
 0x100   :  { %355 = vmatmul.mubr.bf16.vlgmr.msra.gmra.mrb[0].mxu1 %v185_v53 }
 0x1d3   :  { %v431_v55 = vpop.f32.mrb[0].mxu1 }
 0x1d4   :  { %v432_v57 = vpop.f32.mrb[1].mxu1 }
 0x1d5   :  { %v433_v58 = vadd.f32 %v432_v57, %v431_v55  ;;  %v434_v59 = vpop.f32.mrb[2].mxu1 }
 0x1d6   :  { %v435_v60 = vpop.f32.mrb[3].mxu1 }
 0x1d7   :  { %v357_v61 = vadd.f32 %v433_v58, %v398_v56  ;;  %v436_v62 = vadd.f32 %v435_v60, %v434_v59 }
 0x1d9   :  { %363 = vst [vmem:[#allocation2] sm:$0xff] %v357_v61  ;;  %v360_v63 = vadd.f32 %v436_v62, %v398_v56 }
 0x1db   :  { %364 = vst [vmem:[#allocation2 + $0x8] sm:$0xff] %v360_v63 }
 0x1dc   :  { %493 = shalt.err (!%p490_p4)
}
 0x1dd   :  { %s494_s13 = scalar_lea.hbm %s662_s5, 256 }
 0x1de   :  { %p495_p5 = scmp.ne.s32.totalorder %s662_s5, %s494_s13  ;;  %p498_p6 = scmp.lt.u32.totalorder %s494_s13, %s662_s5 }
 0x1e0   :  { %p500_p7 = pnand %p498_p6, %p495_p5 }
 0x1e2   :  { %503 = shalt.err (!%p500_p7)
}
 0x1e3   :  { %s508_s18 = smov 128   ;;  %s509_s19 = smov 8  }
 0x1e4   :  { %376 = dma.vmem_to_hbm [thread:$0]  %s371_s10, 256, %s662_s5, [#allocation3], %s508_s18, %s508_s18, %s509_s19  }
 0x1e5   :  { %504 = dma.done.wait [#allocation3], 256  }
 0x1e6   :  { %505 = vsyncadd [#allocation3], 4294967040 }
 0x1e7   :  { %380 = vsyncpa [#allocation3], 1 }

</bundles_post_ra>
